<compile_context>
chip_gen: v6e
topology: v6e:2x2x1
jax: 0.10.0
libtpu: 0.0.40
codegen_flags: <defaults>
</compile_context>

<pallas_src>
import functools

import jax
import jax.numpy as jnp
import numpy as np
from jax.experimental import pallas as pl
from jax.experimental.pallas import tpu as pltpu


def _shortcut_kernel(x_ref, s_ref, o_ref, *, nb, c, c_out, pad, gp):
    """One grid step handles `nb` images.

    x_ref: (nb*c*gp,     2*gh*W)   rows = (image, channel, row-group)
    s_ref: (2*gh*W,      gh*Wo)    static 0/1 selection matrix
    o_ref: (nb*c_out*gp, gh*Wo)    rows = (image, out-channel, row-group)
    """
    # Stride-2 H/W subsample of every row-group as one MXU matmul.  A 0/1
    # selection with f32 accumulation is exact (each output element is a
    # single product x * 1.0).
    ds = jnp.dot(x_ref[...], s_ref[...], preferred_element_type=jnp.float32)
    ds = ds.astype(o_ref.dtype)

    # Zero-fill once (covers the channel padding), then write each image's
    # data channels with a static slice store.
    o_ref[...] = jnp.zeros(o_ref.shape, o_ref.dtype)
    rin = c * gp
    rout = c_out * gp
    for m in range(nb):
        o_ref[m * rout + pad * gp : m * rout + (pad + c) * gp, :] = (
            ds[m * rin : (m + 1) * rin, :])


def _pick_images_per_block(n, bytes_per_image, target_bytes=2 << 20):
    """Largest divisor of n whose input block fits the target; keep grid >= 2."""
    divs = [d for d in range(1, n + 1) if n % d == 0]
    fitting = [d for d in divs if d * bytes_per_image <= target_bytes] or [1]
    nb = max(fitting)
    if n >= 2 and n // nb < 2:
        smaller = [d for d in fitting if n // d >= 2]
        nb = max(smaller) if smaller else 1
    return nb


def _pick_row_group(ho, wo):
    """Smallest divisor gh of Ho with gh*Wo >= 128 (lane-dense output);
    falls back to the whole image when it has fewer than 128 pixels."""
    for d in range(1, ho + 1):
        if ho % d == 0 and d * wo >= 128:
            return d
    return ho


def lambda_layer_shortcut(x_nchw, planes):
    """Pallas TPU implementation of the option-A LambdaLayer shortcut (NCHW)."""
    n, c, h, w = x_nchw.shape
    pad = planes // 4
    c_out = c + 2 * pad
    # TODO(synk): odd H/W (reference ceil semantics) unsupported by the folded
    # even/odd-row layout; CIFAR ResNet shortcut stages always have even H/W.
    assert h % 2 == 0 and w % 2 == 0, "even spatial dims required"
    ho, wo = h // 2, w // 2

    gh = _pick_row_group(ho, wo)   # output rows folded per matmul row
    gp = ho // gh                  # row-groups per image
    kin = 2 * gh * w               # input lanes per row-group (2*gh input rows)
    nout = gh * wo                 # output lanes per row-group

    itemsize = x_nchw.dtype.itemsize
    nb = _pick_images_per_block(n, c * h * w * itemsize)
    ng = n // nb                   # grid extent

    # Small static 0/1 selection matrix: S[j, q] = 1 iff lane j of a folded
    # input row-group (j = dh*W + w_in, dh in [0, 2*gh)) feeds output lane q
    # (q = i*Wo + v  ->  dh = 2*i, w_in = 2*v).
    j = np.arange(kin)[:, None]
    q = np.arange(nout)[None, :]
    src = 2 * (q // wo) * w + 2 * (q % wo)
    sel = jnp.asarray(j == src, dtype=x_nchw.dtype)

    # Free (metadata-only) reshape: rows = (image, channel, row-group),
    # lanes = the 2*gh consecutive input rows of that group.
    x3 = x_nchw.reshape(ng, nb * c * gp, kin)

    kernel = functools.partial(
        _shortcut_kernel, nb=nb, c=c, c_out=c_out, pad=pad, gp=gp)

    flops = 2 * (n * c * gp) * kin * nout
    bytes_accessed = (n * c * h * w + n * c_out * gp * nout + kin * nout) * itemsize

    out3 = pl.pallas_call(
        kernel,
        out_shape=jax.ShapeDtypeStruct((ng, nb * c_out * gp, nout), x_nchw.dtype),
        grid=(ng,),
        in_specs=[
            # Only the leading (image-group) axis is blocked; the last two
            # block dims equal the array dims -> (8,128) constraint always
            # holds and HBM DMAs are fully contiguous.
            pl.BlockSpec((None, nb * c * gp, kin), lambda b: (b, 0, 0)),
            # Constant block index -> selection matrix is fetched once.
            pl.BlockSpec((kin, nout), lambda b: (0, 0)),
        ],
        out_specs=pl.BlockSpec((None, nb * c_out * gp, nout), lambda b: (b, 0, 0)),
        compiler_params=pltpu.CompilerParams(
            dimension_semantics=("parallel",)),
        cost_estimate=pl.CostEstimate(
            flops=flops, transcendentals=0, bytes_accessed=bytes_accessed),
    )(x3, sel)

    # Free reshape back to NCHW.
    return out3.reshape(n, c_out, ho, wo)


def _reference(x_nchw, planes):
    pad = planes // 4
    ds = x_nchw[:, :, ::2, ::2]
    return jnp.pad(ds, ((0, 0), (pad, pad), (0, 0), (0, 0)))


if __name__ == "__main__":
    key = jax.random.PRNGKey(0)

    # Primary demo shape plus two small configs exercising the multi-image
    # (nb > 1) and multi-row-group (gp > 1) code paths.
    cases = [
        (2, 4, 16, 16, 8),   # required demo shape (planes = 2 * in_planes)
        (8, 4, 16, 16, 8),   # nb > 1 (several images per grid step)
        (2, 4, 32, 32, 8),   # gp > 1 (several row-groups per image)
    ]
    for idx, (N, C, H, W, planes) in enumerate(cases):
        k = jax.random.fold_in(key, idx)
        x = jax.random.normal(k, (N, C, H, W), dtype=jnp.float32)
        out = jax.block_until_ready(lambda_layer_shortcut(x, planes))
        ref = _reference(x, planes)
        assert out.shape == ref.shape, (out.shape, ref.shape)
        np.testing.assert_allclose(np.asarray(out), np.asarray(ref), rtol=0, atol=0)

    print("KERNEL_OK")
</pallas_src>

<mosaic_0001>
module attributes {stable_mosaic.version = 11 : i64} {
  func.func @_shortcut_kernel(%arg0: i32, %arg1: memref<1x4x256xf32, #tpu.memory_space<vmem>>, %arg2: memref<256x64xf32, #tpu.memory_space<vmem>>, %arg3: memref<1x8x64xf32, #tpu.memory_space<vmem>>) attributes {dimension_semantics = [#tpu.dimension_semantics<parallel>], iteration_bounds = array<i64: 2>, scalar_prefetch = 0 : i64, scratch_operands = 0 : i64, tpu.core_type = #tpu.core_type<tc>, window_params = [{transform_indices = @transform_0, window_bounds = array<i64: 1, 4, 256>}, {pipeline_mode = #tpu.pipeline_mode<synchronous>, transform_indices = @transform_1, window_bounds = array<i64: 256, 64>}, {transform_indices = @transform_2, window_bounds = array<i64: 1, 8, 64>}]} {
    %c0 = arith.constant 0 : index
    %c0_0 = arith.constant 0 : index
    %c0_1 = arith.constant 0 : index
    %0 = vector.load %arg1[%c0, %c0_0, %c0_1] : memref<1x4x256xf32, #tpu.memory_space<vmem>>, vector<1x4x256xf32>
    %1 = vector.shape_cast %0 : vector<1x4x256xf32> to vector<4x256xf32>
    %c0_2 = arith.constant 0 : index
    %c0_3 = arith.constant 0 : index
    %2 = vector.load %arg2[%c0_2, %c0_3] : memref<256x64xf32, #tpu.memory_space<vmem>>, vector<256x64xf32>
    %cst = arith.constant dense<0.000000e+00> : vector<4x64xf32>
    %3 = tpu.matmul %1, %2, %cst {dimension_numbers = #tpu.dot_dimension_numbers<[1], [0], [0], [1], [0, 0, 1, 1], [], []>} : vector<4x256xf32>, vector<256x64xf32>, vector<4x64xf32> -> vector<4x64xf32>
    %cst_4 = arith.constant 0.000000e+00 : f32
    %4 = vector.broadcast %cst_4 : f32 to vector<8x64xf32>
    %c0_5 = arith.constant 0 : index
    %c0_6 = arith.constant 0 : index
    %c0_7 = arith.constant 0 : index
    %5 = vector.load %arg3[%c0_5, %c0_6, %c0_7] : memref<1x8x64xf32, #tpu.memory_space<vmem>>, vector<1x8x64xf32>
    %6 = vector.shape_cast %5 : vector<1x8x64xf32> to vector<8x64xf32>
    %7 = vector.shape_cast %4 : vector<8x64xf32> to vector<1x8x64xf32>
    tpu.vector_store %arg3[%c0_5, %c0_6, %c0_7], %7 {strides = array<i32>} : memref<1x8x64xf32, #tpu.memory_space<vmem>>, vector<1x8x64xf32>,
    %c0_8 = arith.constant 0 : index
    %c2 = arith.constant 2 : index
    %c0_9 = arith.constant 0 : index
    %8 = vector.load %arg3[%c0_8, %c2, %c0_9] : memref<1x8x64xf32, #tpu.memory_space<vmem>>, vector<1x4x64xf32>
    %9 = vector.shape_cast %8 : vector<1x4x64xf32> to vector<4x64xf32>
    %10 = vector.shape_cast %3 : vector<4x64xf32> to vector<1x4x64xf32>
    tpu.vector_store %arg3[%c0_8, %c2, %c0_9], %10 {strides = array<i32>} : memref<1x8x64xf32, #tpu.memory_space<vmem>>, vector<1x4x64xf32>,
    return
  }
  func.func @transform_0(%arg0: i32) -> (i32, i32, i32) {
    %c0_i32 = arith.constant 0 : i32
    %c0_i32_0 = arith.constant 0 : i32
    %c0_i32_1 = arith.constant 0 : i32
    return %arg0, %c0_i32, %c0_i32_0 : i32, i32, i32
  }
  func.func @transform_1(%arg0: i32) -> (i32, i32) {
    %c0_i32 = arith.constant 0 : i32
    %c0_i32_0 = arith.constant 0 : i32
    %c0_i32_1 = arith.constant 0 : i32
    return %c0_i32, %c0_i32_0 : i32, i32
  }
  func.func @transform_2(%arg0: i32) -> (i32, i32, i32) {
    %c0_i32 = arith.constant 0 : i32
    %c0_i32_0 = arith.constant 0 : i32
    %c0_i32_1 = arith.constant 0 : i32
    return %arg0, %c0_i32, %c0_i32_0 : i32, i32, i32
  }
}

</mosaic_0001>

<bundles_post_ra>
// kernel: tpu_custom_call.1
= control target key start
LH: loop header
LB: loop body
LE: loop exit
PB: predicated region body
PF: predicated region fallthrough
CT: control target
= control target key end

     0   :  { %7 = vsyncpa [#allocation3], 0  ;;  %s675_s0 = inlined_call_operand.vmem [shape: f32[2,4,256], index: 0, kind: input, shape index: {}]   ;;  %s676_s1 = inlined_call_operand.vmem [shape: f32[256,64], index: 1, kind: input, shape index: {}]   ;;  %s677_s2 = inlined_call_operand.hbm [shape: f32[2,8,64], index: 2, kind: output, shape index: {}]  }
   0x1   :  { %9 = vsyncpa [#allocation3 + $0x1], 0  ;;  %s492_s9 = smov 0   ;;  %s494_s10 = smov 0  }
   0x2   :  { %s496_s11 = smov 0   ;;  %s498_s12 = smov 0  }
   0x3 LB: > { %s513_s13 = sadd.s32 4294967295, %s473_s12   ;;  %s325_s14 = sadd.s32 4294967294, %s473_s12   ;;  %s473_s12 = sphi %s498_s12, %s683_s12   ;;  %s469_s11 = sphi %s496_s11, %s682_s11   ;;  %s465_s10 = sphi %s494_s10, %s681_s10   ;;  %s461_s9 = sphi %s492_s9, %s680_s9  }
   0x4   : > { %s517_s15 = sadd.s32 1, %s473_s12   ;;  %s69_s16 = sadd.s32 1, %s469_s11 }
   0x5   : > { %s66_s17 = ssub.s32 %s473_s12, %s517_s15  ;;  %p79_p0 = scmp.ne.s32.totalorder %s469_s11, %s465_s10 }
   0x6   : > { %p67_p1 = scmp.eq.s32.totalorder %s66_s17, 0  ;;  %p80_p2 = scmp.eq.s32.totalorder %s513_s13, 1 }
   0x7   : > { %p85_p3 = scmp.ne.s32.totalorder %s465_s10, %s461_s9  ;;  %p86_p4 = scmp.eq.s32.totalorder %s325_s14, 1 }
   0x8   : > { %s528_s18 = scalar_select %p67_p1, %s469_s11, %s69_s16  }
   0x9   : > { %p530_p5 = por %p80_p2, %p79_p0  ;;  %p534_p6 = por %p86_p4, %p85_p3 }
   0xa   : > { %p328_p7 = scmp.ge.s32.totalorder %s473_s12, 1  ;;  %p115_p8 = scmp.lt.s32.totalorder %s473_s12, 3 }
   0xc   : > { %p116_p9 = pnand %p328_p7, %p115_p8 }
   0xd   : > { %p137_p10 = scmp.lt.s32.totalorder (!%p116_p9), %s513_s13, 1  ;;  %s134_s5 = sand.u32 (!%p116_p9), 1, %s465_s10  }
   0xe   : > { %119 = sbr.rel (%p116_p9) target bundleno = 262 (0x106), region = 28  ;;  %s329_s6 = sshll.u32 (!%p116_p9), %s134_s5, 3 }
   0xf   : > { %s136_s7 = scalar_lea.vmem (!%p116_p9), [#allocation2], %s329_s6  ;;  %s253_s22 = scalar_lea.sflag (!%p116_p9), [#allocation3], %s134_s5 }
  0x10   : > { %s266_s14 = sshll.u32 (!%p116_p9), %s136_s7, 4  ;;  %s476_s24 = smov (!%p116_p9), [#allocation2]   ;;  %s267_s14 = int_to_ptr.vmem [resolvable:$true] %s266_s14 }
  0x11   : > { %s413_s23 = scalar_lea.vmem (!%p116_p9), %s267_s14, 128  ;;  %s417_s25 = sshll.u32 (!%p116_p9), %s476_s24, 4  ;;  %s418_s25 = int_to_ptr.vmem [resolvable:$false] %s417_s25 }
  0x12   : > { %p414_p11 = scmp.ne.s32.totalorder (!%p116_p9), %s267_s14, %s413_s23  ;;  %p420_p0 = scmp.lt.s32.totalorder (!%p116_p9), %s267_s14, %s418_s25 }
  0x13   : > { %v174_v0 = vld [vmem:[%s676_s1 + $0xf8] sm:$0xff]  ;;  %v173_v2 = vld [vmem:[%s676_s1 + $0xf0] sm:$0xff]  ;;  %v172_v4 = vld [vmem:[%s676_s1 + $0xe8] sm:$0xff]  ;;  %s138_s3 = scalar_select %p137_p10, %s513_s13, 1  ;;  %vm248_vm0 = vcmask 523264   ;;  %v475_v34 = vmov 0.0  }
  0x14   : > { %v158_v1 = vld [vmem:[%s676_s1 + $0x78] sm:$0xff]  ;;  %337 = vmatprep.subr.mxu0 %v174_v0  ;;  %v157_v3 = vld [vmem:[%s676_s1 + $0x70] sm:$0xff]  ;;  %v156_v5 = vld [vmem:[%s676_s1 + $0x68] sm:$0xff]  ;;  %249 = vst.msk [vmem:[%s136_s7] sm:$0xff] %vm248_vm0, %v475_v34  ;;  %vm250_vm1 = vcmask 519168   ;;  %p415_p12 = pnand %p414_p11, %p530_p5 }
  0x15   : > { %338 = vmatpush3.msra.mxu0 %v158_v1  ;;  %v171_v6 = vld [vmem:[%s676_s1 + $0xe0] sm:$0xff]  ;;  %s336_s8 = sshll.u32 %s138_s3, 3  ;;  %v170_v8 = vld [vmem:[%s676_s1 + $0xd8] sm:$0xff]  ;;  %v169_v10 = vld [vmem:[%s676_s1 + $0xd0] sm:$0xff] }
  0x16   : > { %339 = vmatprep.subr.mxu0 %v173_v2  ;;  %v155_v7 = vld [vmem:[%s676_s1 + $0x60] sm:$0xff]  ;;  %v154_v9 = vld [vmem:[%s676_s1 + $0x58] sm:$0xff]  ;;  %s141_s26 = scalar_lea.vmem %s675_s0, %s336_s8  ;;  %v153_v11 = vld [vmem:[%s676_s1 + $0x50] sm:$0xff]  ;;  %s333_s8 = sshll.u32 %s513_s13, 7 }
  0x17   : > { %340 = vmatpush3.msra.mxu0 %v157_v3  ;;  %v168_v12 = vld [vmem:[%s676_s1 + $0xc8] sm:$0xff]  ;;  %v142_v13 = vld [vmem:[%s141_s26] sm:$0xff]  ;;  %v166_v18 = vld [vmem:[%s676_s1 + $0xb8] sm:$0xff]  ;;  %s264_s21 = scalar_lea.hbm %s677_s2, %s333_s8  ;;  %p416_p13 = pneg %p415_p12 }
  0x18   : > { %341 = vmatprep.subr.mxu0 %v172_v4  ;;  %v152_v14 = vld [vmem:[%s676_s1 + $0x48] sm:$0xff]  ;;  %v176_v15 = vcombine.high %v142_v13, %v142_v13  ;;  %v167_v16 = vld [vmem:[%s676_s1 + $0xc0] sm:$0xff]  ;;  %v150_v19 = vld [vmem:[%s676_s1 + $0x38] sm:$0xff]  ;;  %s419_s13 = scalar_lea.vmem %s418_s25, 256 }
  0x19   : > { %342 = vmatpush3.msra.mxu0 %v156_v5  ;;  %v151_v17 = vld [vmem:[%s676_s1 + $0x40] sm:$0xff]  ;;  %v165_v20 = vld [vmem:[%s676_s1 + $0xb0] sm:$0xff]  ;;  %v164_v22 = vld [vmem:[%s676_s1 + $0xa8] sm:$0xff]  ;;  %p421_p1 = scmp.lt.s32.totalorder %s419_s13, %s413_s23 }
  0x1a   : > { %343 = vmatprep.subr.mxu0 %v171_v6  ;;  %242 = vmatprep.mubr.f32.mxu0 %v176_v15  ;;  %v149_v21 = vld [vmem:[%s676_s1 + $0x30] sm:$0xff]  ;;  %v148_v23 = vld [vmem:[%s676_s1 + $0x28] sm:$0xff]  ;;  %v163_v24 = vld [vmem:[%s676_s1 + $0xa0] sm:$0xff] }
  0x1b   : > { %344 = vmatpush3.msra.mxu0 %v155_v7  ;;  %v147_v25 = vld [vmem:[%s676_s1 + $0x20] sm:$0xff]  ;;  %v162_v26 = vld [vmem:[%s676_s1 + $0x98] sm:$0xff]  ;;  %v161_v28 = vld [vmem:[%s676_s1 + $0x90] sm:$0xff]  ;;  %p422_p2 = por %p421_p1, %p420_p0 }
  0x1c   : > { %345 = vmatprep.subr.mxu0 %v170_v8  ;;  %v146_v27 = vld [vmem:[%s676_s1 + $0x18] sm:$0xff]  ;;  %v145_v29 = vld [vmem:[%s676_s1 + $0x10] sm:$0xff]  ;;  %v160_v30 = vld [vmem:[%s676_s1 + $0x88] sm:$0xff] }
  0x1d   : > { %346 = vmatpush3.msra.mxu0 %v154_v9  ;;  %v144_v31 = vld [vmem:[%s676_s1 + $0x8] sm:$0xff]  ;;  %v159_v32 = vld [vmem:[%s676_s1 + $0x80] sm:$0xff]  ;;  %p423_p3 = pnand %p422_p2, %p416_p13 }
  0x1e   : > { %347 = vmatprep.subr.mxu0 %v169_v10  ;;  %v143_v33 = vld [vmem:[%s676_s1] sm:$0xff] }
  0x1f   : > { %348 = vmatpush3.msra.mxu0 %v153_v11 }
  0x20   : > { %349 = vmatprep.subr.mxu0 %v168_v12 }
  0x21   : > { %350 = vmatpush3.msra.mxu0 %v152_v14 }
  0x22   : > { %351 = vmatprep.subr.mxu0 %v167_v16 }
  0x23   : > { %352 = vmatpush3.msra.mxu0 %v151_v17 }
  0x24   : > { %353 = vmatprep.subr.mxu0 %v166_v18 }
  0x25   : > { %354 = vmatpush3.msra.mxu0 %v150_v19 }
  0x26   : > { %355 = vmatprep.subr.mxu0 %v165_v20 }
  0x27   : > { %356 = vmatpush3.msra.mxu0 %v149_v21 }
  0x28   : > { %357 = vmatprep.subr.mxu0 %v164_v22 }
  0x29   : > { %358 = vmatpush3.msra.mxu0 %v148_v23 }
  0x2a   : > { %359 = vmatprep.subr.mxu0 %v163_v24 }
  0x2b   : > { %360 = vmatpush3.msra.mxu0 %v147_v25 }
  0x2c   : > { %361 = vmatprep.subr.mxu0 %v162_v26 }
  0x2d   : > { %362 = vmatpush3.msra.mxu0 %v146_v27 }
  0x2e   : > { %363 = vmatprep.subr.mxu0 %v161_v28 }
  0x2f   : > { %364 = vmatpush3.msra.mxu0 %v145_v29 }
  0x30   : > { %365 = vmatprep.subr.mxu0 %v160_v30 }
  0x31   : > { %366 = vmatpush3.msra.mxu0 %v144_v31 }
  0x32   : > { %367 = vmatprep.subr.mxu0 %v159_v32 }
  0x33   : > { %368 = vmatpush3.msra.mxu0 %v143_v33 }
  0x34   : > { %243 = vmatmul.mubr.f32.vlgmr.msra.gmra.mxu0 %v142_v13 }
  0xf4   : > { %v369_v35 = vpop.f32.mrf.mxu0 }
  0xf6   : > { %v370_v36 = vpop.f32.mrf.mxu0 }
  0xf7   : > { %v371_v37 = vadd.f32 %v370_v36, %v369_v35 }
  0xf9   : > { %251 = vst.msk [vmem:[%s136_s7 + $0x2] sm:$0xf] %vm250_vm1, %v371_v37 }
  0xfa   : > { %426 = shalt.err (!%p423_p3)
}
  0xfb   : > { %s427_s26 = scalar_lea.hbm %s264_s21, 128  ;;  %s431_s29 = scalar_lea.hbm %s677_s2, 256 }
  0xfc   : > { %p428_p4 = scmp.ne.s32.totalorder %s264_s21, %s427_s26  ;;  %p432_p9 = scmp.lt.s32.totalorder %s264_s21, %s677_s2 }
  0xfd   : > { %p433_p10 = scmp.lt.s32.totalorder %s431_s29, %s427_s26 }
  0xfe   : > { %p429_p7 = pnand %p428_p4, %p530_p5 }
  0xff   : > { %p434_p11 = por %p433_p10, %p432_p9 }
 0x100   : > { %p430_p8 = pneg %p429_p7 }
 0x102   : > { %p435_p12 = pnand %p434_p11, %p430_p8 }
 0x104   : > { %438 = shalt.err (!%p435_p12)
}
 0x105   : > { %372 = dma.vmem_to_hbm [thread:$0]  (%p530_p5), %s267_s14, 128, %s264_s21, %s253_s22  }
 0x106 PF: > { %p378_p13 = scmp.ge.s32.totalorder %s473_s12, 2  ;;  %s278_s4 = sand.u32 1, %s461_s9  }
 0x107   : > { %s279_s5 = scalar_lea.sflag [#allocation3], %s278_s4 }
 0x108   : > { %p375_p0 = pnand %p378_p13, %p534_p6 }
 0x10a   : > { %p376_p1 = pneg %p375_p0 }
 0x10c   : > { %456 = dma.done.wait (%p376_p1), %s279_s5, 128  }
 0x10d   : > { %458 = vsyncadd (%p376_p1), %s279_s5, 4294967168  ;;  %p12_p2 = scmp.ge.s32.totalorder %s517_s15, 4   ;;  %s680_s9 = smov %s465_s10 }
 0x10e   : > { %s681_s10 = smov %s469_s11  ;;  %s682_s11 = smov %s528_s18 }
 0x10f   : > { %s683_s12 = smov %s517_s15  ;;  %14 = sbr.rel (!%p12_p2) target bundleno = 3 (0x3), region = 63 }
 0x114   :  { %284 = vsyncpa [#allocation3], 1 }
 0x115   :  { %286 = vsyncpa [#allocation3 + $0x1], 1 }

</bundles_post_ra>
